<compile_context>
chip_gen: v5e
topology: v5e:2x2
jax: 0.10.0
libtpu: 0.0.40
codegen_flags: <defaults>
</compile_context>

<pallas_src>
import jax
import jax.numpy as jnp
from jax.experimental import pallas as pl
from jax.experimental.pallas import tpu as pltpu

LANE = 128
SUBLANE = 8
# (2, 4096, 128) f32 input block = 4 MiB + (4096, 128) output block = 2 MiB
# per step; ~12 MiB double-buffered — safe on every generation's scoped VMEM.
ROW_TILE_MAX = 4096


def _round_up(n: int, m: int) -> int:
    return ((n + m - 1) // m) * m


def _pick_row_tile(rows: int) -> int:
    """Largest multiple-of-8 divisor of `rows` <= ROW_TILE_MAX, preferring
    a tile that leaves >= 2 grid steps (v7x has 2 TensorCores)."""
    target = min(ROW_TILE_MAX, rows)
    if rows >= 2 * SUBLANE:
        target = min(target, max(SUBLANE, rows // 2))
    r = (target // SUBLANE) * SUBLANE
    while r > SUBLANE and rows % r != 0:
        r -= SUBLANE
    return max(r, SUBLANE)


def _sigmoid(z):
    # sigmoid(z) = 0.5 * (tanh(z/2) + 1): one EUP transcendental, bounded
    # (no clamp / Newton step needed), well within f32 accuracy.
    return 0.5 * (jnp.tanh(0.5 * z) + 1.0)


def simple_nn_kernel(p_ref, x_ref, o_ref):
    # p_ref: SMEM f32[9] = [w1_00, w1_01, w1_10, w1_11, b1_0, b1_1,
    #                       w2_0, w2_1, b2]        (weights stored [in, out])
    # x_ref: VMEM (2, R, 128) — feature-major, batch dense on sublanes+lanes
    # o_ref: VMEM (R, 128)
    #
    # Hoist the 9 scalar reads/splats once (JAX does not CSE them per use).
    w1_00 = p_ref[0]
    w1_01 = p_ref[1]
    w1_10 = p_ref[2]
    w1_11 = p_ref[3]
    b1_0 = p_ref[4]
    b1_1 = p_ref[5]
    w2_0 = p_ref[6]
    w2_1 = p_ref[7]
    b2 = p_ref[8]

    x0 = x_ref[0]                      # (R, 128) fully dense tile
    x1 = x_ref[1]                      # (R, 128)

    # fc1 + sigmoid: K=2 contraction as VPU scalar*vector FMAs (no MXU).
    h0 = _sigmoid(x0 * w1_00 + x1 * w1_10 + b1_0)
    h1 = _sigmoid(x0 * w1_01 + x1 * w1_11 + b1_1)

    # fc2 + sigmoid: dense (R, 128) unmasked full-vreg store.
    o_ref[...] = _sigmoid(h0 * w2_0 + h1 * w2_1 + b2)


def simple_nn_forward(x, w1, b1, w2, b2):
    """x: (B, 2) f32.  w1: (2,2) [in,out], b1: (2,), w2: (2,1) [in,out], b2: (1,).

    Returns (B, 1) f32 — same math as torch: sigmoid(fc2(sigmoid(fc1(x)))).
    """
    B = x.shape[0]

    # Pad the batch to a multiple of 1024 (8 sublanes x 128 lanes); padding is
    # independent of the tile size, so junk work stays < 1024 elements.
    b_pad = _round_up(max(B, 1), SUBLANE * LANE)
    rows = b_pad // LANE                 # multiple of 8
    r_tile = _pick_row_tile(rows)
    nb = rows // r_tile

    # Feature-major, (sublane, lane)-dense layout: (2, rows, 128).
    xt = jnp.pad(x.T.astype(jnp.float32), ((0, 0), (0, b_pad - B)))
    xt = xt.reshape(2, rows, LANE)

    # All 9 parameters packed into one small SMEM-resident array.
    params = jnp.concatenate(
        [w1.reshape(-1), b1.reshape(-1), w2.reshape(-1), b2.reshape(-1)]
    ).astype(jnp.float32)                                        # (9,)

    out = pl.pallas_call(
        simple_nn_kernel,
        out_shape=jax.ShapeDtypeStruct((rows, LANE), jnp.float32),
        grid=(nb,),
        in_specs=[
            # Whole parameter vector in SMEM (scalar reads, no VMEM tile/DMA).
            pl.BlockSpec(memory_space=pltpu.MemorySpace.SMEM),
            # Batch-tiled, sublane+lane-dense input.
            pl.BlockSpec((2, r_tile, LANE), lambda i: (0, i, 0)),
        ],
        out_specs=pl.BlockSpec((r_tile, LANE), lambda i: (i, 0)),
        compiler_params=pltpu.CompilerParams(
            dimension_semantics=("parallel",),
        ),
    )(params, xt)

    return out.reshape(-1)[:B][:, None]                          # (B, 1)


def init_params(key):
    """Deterministic init mimicking PyTorch Linear defaults (U(-1/sqrt(fan_in), +))."""
    k1, k2, k3, k4 = jax.random.split(key, 4)
    bound = 1.0 / jnp.sqrt(2.0)  # fan_in = 2 for both layers
    # Stored already transposed: (in_features, out_features)
    w1 = jax.random.uniform(k1, (2, 2), jnp.float32, -bound, bound)
    b1 = jax.random.uniform(k2, (2,), jnp.float32, -bound, bound)
    w2 = jax.random.uniform(k3, (2, 1), jnp.float32, -bound, bound)
    b2 = jax.random.uniform(k4, (1,), jnp.float32, -bound, bound)
    return w1, b1, w2, b2


if __name__ == "__main__":
    key = jax.random.PRNGKey(0)
    kx, kp = jax.random.split(key)

    batch = 8  # tiny demo batch; launch overhead dominates at this size
    x = jax.random.normal(kx, (batch, 2), jnp.float32)
    w1, b1, w2, b2 = init_params(kp)

    out = simple_nn_forward(x, w1, b1, w2, b2)
    out = jax.block_until_ready(out)

    # Reference in plain JAX (same math as the PyTorch forward).
    ref = jax.nn.sigmoid(jax.nn.sigmoid(x @ w1 + b1) @ w2 + b2)
    assert out.shape == (batch, 1)
    assert jnp.allclose(out, ref, atol=1e-4, rtol=1e-4), (
        f"max abs err {jnp.max(jnp.abs(out - ref))}"
    )

    print("KERNEL_OK")
</pallas_src>

<mosaic_0001>
module attributes {stable_mosaic.version = 11 : i64} {
  func.func @simple_nn_kernel(%arg0: i32, %arg1: memref<9xf32, #tpu.memory_space<smem>>, %arg2: memref<2x8x128xf32, #tpu.memory_space<vmem>>, %arg3: memref<8x128xf32, #tpu.memory_space<vmem>>) attributes {dimension_semantics = [#tpu.dimension_semantics<parallel>], iteration_bounds = array<i64: 1>, scalar_prefetch = 0 : i64, scratch_operands = 0 : i64, tpu.core_type = #tpu.core_type<tc>, window_params = [{transform_indices = @transform_0, window_bounds = array<i64: 9>}, {transform_indices = @transform_1, window_bounds = array<i64: 2, 8, 128>}, {transform_indices = @transform_2, window_bounds = array<i64: 8, 128>}]} {
    %c0 = arith.constant 0 : index
    %0 = memref.load %arg1[%c0] : memref<9xf32, #tpu.memory_space<smem>>
    %c1 = arith.constant 1 : index
    %1 = memref.load %arg1[%c1] : memref<9xf32, #tpu.memory_space<smem>>
    %c2 = arith.constant 2 : index
    %2 = memref.load %arg1[%c2] : memref<9xf32, #tpu.memory_space<smem>>
    %c3 = arith.constant 3 : index
    %3 = memref.load %arg1[%c3] : memref<9xf32, #tpu.memory_space<smem>>
    %c4 = arith.constant 4 : index
    %4 = memref.load %arg1[%c4] : memref<9xf32, #tpu.memory_space<smem>>
    %c5 = arith.constant 5 : index
    %5 = memref.load %arg1[%c5] : memref<9xf32, #tpu.memory_space<smem>>
    %c6 = arith.constant 6 : index
    %6 = memref.load %arg1[%c6] : memref<9xf32, #tpu.memory_space<smem>>
    %c7 = arith.constant 7 : index
    %7 = memref.load %arg1[%c7] : memref<9xf32, #tpu.memory_space<smem>>
    %c8 = arith.constant 8 : index
    %8 = memref.load %arg1[%c8] : memref<9xf32, #tpu.memory_space<smem>>
    %c0_0 = arith.constant 0 : index
    %c0_1 = arith.constant 0 : index
    %c0_2 = arith.constant 0 : index
    %9 = vector.load %arg2[%c0_0, %c0_1, %c0_2] : memref<2x8x128xf32, #tpu.memory_space<vmem>>, vector<1x8x128xf32>
    %10 = vector.shape_cast %9 : vector<1x8x128xf32> to vector<8x128xf32>
    %c1_3 = arith.constant 1 : index
    %c0_4 = arith.constant 0 : index
    %c0_5 = arith.constant 0 : index
    %11 = vector.load %arg2[%c1_3, %c0_4, %c0_5] : memref<2x8x128xf32, #tpu.memory_space<vmem>>, vector<1x8x128xf32>
    %12 = vector.shape_cast %11 : vector<1x8x128xf32> to vector<8x128xf32>
    %13 = vector.broadcast %0 : f32 to vector<8x128xf32>
    %14 = arith.mulf %10, %13 : vector<8x128xf32>
    %15 = vector.broadcast %2 : f32 to vector<8x128xf32>
    %16 = arith.mulf %12, %15 : vector<8x128xf32>
    %17 = arith.addf %14, %16 : vector<8x128xf32>
    %18 = vector.broadcast %4 : f32 to vector<8x128xf32>
    %19 = arith.addf %17, %18 : vector<8x128xf32>
    %cst = arith.constant 5.000000e-01 : f32
    %20 = vector.broadcast %cst : f32 to vector<8x128xf32>
    %21 = arith.mulf %20, %19 : vector<8x128xf32>
    %22 = math.tanh %21 : vector<8x128xf32>
    %cst_6 = arith.constant 1.000000e+00 : f32
    %23 = vector.broadcast %cst_6 : f32 to vector<8x128xf32>
    %24 = arith.addf %22, %23 : vector<8x128xf32>
    %cst_7 = arith.constant 5.000000e-01 : f32
    %25 = vector.broadcast %cst_7 : f32 to vector<8x128xf32>
    %26 = arith.mulf %25, %24 : vector<8x128xf32>
    %27 = vector.broadcast %1 : f32 to vector<8x128xf32>
    %28 = arith.mulf %10, %27 : vector<8x128xf32>
    %29 = vector.broadcast %3 : f32 to vector<8x128xf32>
    %30 = arith.mulf %12, %29 : vector<8x128xf32>
    %31 = arith.addf %28, %30 : vector<8x128xf32>
    %32 = vector.broadcast %5 : f32 to vector<8x128xf32>
    %33 = arith.addf %31, %32 : vector<8x128xf32>
    %cst_8 = arith.constant 5.000000e-01 : f32
    %34 = vector.broadcast %cst_8 : f32 to vector<8x128xf32>
    %35 = arith.mulf %34, %33 : vector<8x128xf32>
    %36 = math.tanh %35 : vector<8x128xf32>
    %cst_9 = arith.constant 1.000000e+00 : f32
    %37 = vector.broadcast %cst_9 : f32 to vector<8x128xf32>
    %38 = arith.addf %36, %37 : vector<8x128xf32>
    %cst_10 = arith.constant 5.000000e-01 : f32
    %39 = vector.broadcast %cst_10 : f32 to vector<8x128xf32>
    %40 = arith.mulf %39, %38 : vector<8x128xf32>
    %41 = vector.broadcast %6 : f32 to vector<8x128xf32>
    %42 = arith.mulf %26, %41 : vector<8x128xf32>
    %43 = vector.broadcast %7 : f32 to vector<8x128xf32>
    %44 = arith.mulf %40, %43 : vector<8x128xf32>
    %45 = arith.addf %42, %44 : vector<8x128xf32>
    %46 = vector.broadcast %8 : f32 to vector<8x128xf32>
    %47 = arith.addf %45, %46 : vector<8x128xf32>
    %cst_11 = arith.constant 5.000000e-01 : f32
    %48 = vector.broadcast %cst_11 : f32 to vector<8x128xf32>
    %49 = arith.mulf %48, %47 : vector<8x128xf32>
    %50 = math.tanh %49 : vector<8x128xf32>
    %cst_12 = arith.constant 1.000000e+00 : f32
    %51 = vector.broadcast %cst_12 : f32 to vector<8x128xf32>
    %52 = arith.addf %50, %51 : vector<8x128xf32>
    %cst_13 = arith.constant 5.000000e-01 : f32
    %53 = vector.broadcast %cst_13 : f32 to vector<8x128xf32>
    %54 = arith.mulf %53, %52 : vector<8x128xf32>
    %c0_14 = arith.constant 0 : index
    %c0_15 = arith.constant 0 : index
    %55 = vector.load %arg3[%c0_14, %c0_15] : memref<8x128xf32, #tpu.memory_space<vmem>>, vector<8x128xf32>
    tpu.vector_store %arg3[%c0_14, %c0_15], %54 {strides = array<i32>} : memref<8x128xf32, #tpu.memory_space<vmem>>, vector<8x128xf32>,
    return
  }
  func.func @transform_0(%arg0: i32) -> i32 {
    %c0_i32 = arith.constant 0 : i32
    %c0_i32_0 = arith.constant 0 : i32
    return %c0_i32 : i32
  }
  func.func @transform_1(%arg0: i32) -> (i32, i32, i32) {
    %c0_i32 = arith.constant 0 : i32
    %c0_i32_0 = arith.constant 0 : i32
    %c0_i32_1 = arith.constant 0 : i32
    return %c0_i32, %arg0, %c0_i32_0 : i32, i32, i32
  }
  func.func @transform_2(%arg0: i32) -> (i32, i32) {
    %c0_i32 = arith.constant 0 : i32
    %c0_i32_0 = arith.constant 0 : i32
    return %arg0, %c0_i32 : i32, i32
  }
}

</mosaic_0001>

<bundles_post_ra>
// kernel: tpu_custom_call.1
= control target key start
LH: loop header
LB: loop body
LE: loop exit
PB: predicated region body
PF: predicated region fallthrough
CT: control target
= control target key end

     0   :  { %7 = vsyncpa [#allocation5], 0  ;;  %s219_s0 = inlined_call_operand.hbm [shape: f32[9], index: 0, kind: input, shape index: {}]   ;;  %s220_s1 = inlined_call_operand.hbm [shape: f32[2,8,128], index: 1, kind: input, shape index: {}]   ;;  %s221_s2 = inlined_call_operand.hbm [shape: f32[8,128], index: 2, kind: output, shape index: {}]  }
   0x1   :  { %8 = vsyncpa [#allocation3], 0 }
   0x2   :  { %9 = vsyncpa [#allocation4], 0  ;;  %s15_s11 = sshll.u32 %s219_s0, 4  ;;  %s23_s14 = sshll.u32 %s220_s1, 4  ;;  %s16_s11 = int_to_ptr.hbm [resolvable:$true] %s15_s11  ;;  %s24_s14 = int_to_ptr.hbm [resolvable:$true] %s23_s14 }
   0x3   :  { %s190_s15 = smov [#allocation2]   ;;  %s191_s16 = smov [#allocation6]  }
   0x4   :  { %18 = dma.hbm_to_smem %s16_s11, 16, %s190_s15, [#allocation5]  }
   0x5   :  { %s25_s17 = sshll.u32 %s191_s16, 4  ;;  %s192_s18 = smov 128   ;;  %s26_s17 = int_to_ptr.vmem [resolvable:$true] %s25_s17 }
   0x6   :  { %s193_s19 = smov 8  }
   0x7   :  { %31 = dma.hbm_to_vmem [thread:$0]  %s24_s14, 256, %s26_s17, [#allocation3], %s192_s18, %s192_s18, %s193_s19  }
   0x8   :  { %184 = dma.done.wait [#allocation5], 16  }
   0x9   :  { %185 = vsyncadd [#allocation5], 4294967280 }
   0xa   :  { %186 = dma.done.wait [#allocation3], 256  }
   0xb   :  { %187 = vsyncadd [#allocation3], 4294967040 }
   0xc   :  { %40 = sfence }
   0xd   :  { %s41_s0 = sld [smem:[#allocation2]]  ;;  %v50_v0 = vld [vmem:[#allocation6] sm:$0xff]  ;;  %v52_v1 = vld [vmem:[#allocation6 + $0x8] sm:$0xff]  ;;  %s194_s27 = smov [#allocation7]  }
   0xe   :  { %s105_s20 = sld [smem:[#allocation2 + $0x1]]  ;;  %s92_s28 = sshll.u32 %s194_s27, 4  ;;  %s93_s28 = int_to_ptr.vmem [resolvable:$true] %s92_s28 }
   0xf   :  { %s106_s21 = sld [smem:[#allocation2 + $0x2]]  ;;  %s94_s3 = sshll.u32 %s221_s2, 4  ;;  %s95_s3 = int_to_ptr.hbm [resolvable:$true] %s94_s3 }
  0x10   :  { %s107_s22 = sld [smem:[#allocation2 + $0x3]] }
  0x11   :  { %s108_s23 = sld [smem:[#allocation2 + $0x4]] }
  0x12   :  { %s109_s1 = sld [smem:[#allocation2 + $0x5]] }
  0x13   :  { %v53_v2 = vstv %s41_s0  ;;  %s110_s24 = sld [smem:[#allocation2 + $0x6]] }
  0x14   :  { %v54_v3 = vmul.f32 %v53_v2, %v50_v0  ;;  %v64_v4 = vstv %s105_s20  ;;  %s111_s25 = sld [smem:[#allocation2 + $0x7]] }
  0x15   :  { %v55_v5 = vstv %s106_s21  ;;  %v65_v6 = vmul.f32 %v64_v4, %v50_v0  ;;  %s112_s26 = sld [smem:[#allocation2 + $0x8]] }
  0x16   :  { %v56_v7 = vmul.f32 %v55_v5, %v52_v1  ;;  %v66_v8 = vstv %s107_s22 }
  0x17   :  { %v58_v9 = vstv %s108_s23  ;;  %v67_v10 = vmul.f32 %v66_v8, %v52_v1 }
  0x18   :  { %v57_v11 = vadd.f32 %v56_v7, %v54_v3  ;;  %v69_v12 = vstv %s109_s1 }
  0x19   :  { %v68_v13 = vadd.f32 %v67_v10, %v65_v6  ;;  %v75_v22 = vstv %s110_s24 }
  0x1a   :  { %v59_v14 = vadd.f32 %v58_v9, %v57_v11  ;;  %v77_v24 = vstv %s111_s25 }
  0x1b   :  { %v70_v15 = vadd.f32 %v69_v12, %v68_v13  ;;  %v80_v28 = vstv %s112_s26 }
  0x1c   :  { %v60_v16 = vmul.f32 0.5, %v59_v14 }
  0x1d   :  { %v71_v17 = vmul.f32 0.5, %v70_v15 }
  0x1e   :  { %118 = vtanh.f32 %v60_v16 }
  0x1f   :  { %120 = vtanh.f32 %v71_v17 }
  0x24   :  { %v119_v18 = vpop.eup %118 }
  0x25   :  { %v121_v19 = vpop.eup %120  ;;  %v62_v20 = vadd.f32 1.0, %v119_v18 }
  0x26   :  { %v73_v21 = vadd.f32 1.0, %v121_v19 }
  0x27   :  { %v63_v23 = vmul.f32 0.5, %v62_v20 }
  0x28   :  { %v74_v25 = vmul.f32 0.5, %v73_v21 }
  0x29   :  { %v76_v26 = vmul.f32 %v75_v22, %v63_v23 }
  0x2a   :  { %v78_v27 = vmul.f32 %v77_v24, %v74_v25 }
  0x2c   :  { %v79_v29 = vadd.f32 %v78_v27, %v76_v26 }
  0x2e   :  { %v81_v30 = vadd.f32 %v80_v28, %v79_v29 }
  0x30   :  { %v82_v31 = vmul.f32 0.5, %v81_v30 }
  0x32   :  { %122 = vtanh.f32 %v82_v31 }
  0x38   :  { %v123_v32 = vpop.eup %122 }
  0x39   :  { %v84_v33 = vadd.f32 1.0, %v123_v32 }
  0x3b   :  { %v85_v34 = vmul.f32 0.5, %v84_v33 }
  0x3d   :  { %86 = vst [vmem:[#allocation7] sm:$0xff] %v85_v34 }
  0x3e   :  { %97 = dma.vmem_to_hbm [thread:$0]  %s93_s28, 128, %s95_s3, [#allocation4]  }
  0x3f   :  { %188 = dma.done.wait [#allocation4], 128  }
  0x40   :  { %189 = vsyncadd [#allocation4], 4294967168 }
  0x41   :  { %102 = vsyncpa [#allocation3], 1 }
  0x42   :  { %103 = vsyncpa [#allocation4], 1 }
  0x43   :  { %104 = vsyncpa [#allocation5], 1 }

</bundles_post_ra>
